<compile_context>
chip_gen: v7x
topology: tpu7x:2x2x1
jax: 0.10.0
libtpu: 0.0.40
codegen_flags: <defaults>
</compile_context>

<pallas_src>
import functools

import jax
import jax.numpy as jnp
from jax.experimental import pallas as pl
from jax.experimental.pallas import tpu as pltpu


def _leaky_relu(x, slope=0.2):
    return jnp.where(x > 0, x, slope * x)


def _gcn_kernel(x_ref, adj_ref, wt_ref, b_ref, out_ref, *, bb, c_in, n_nodes):
    """One batch-block of the GraphConvolution forward.

    x_ref:   (bb*C_in, N)   channel-major rows, batch folded into M
    adj_ref: (N, N)
    wt_ref:  (C_in, C_out)  Conv1d weight, pre-transposed in the wrapper
    b_ref:   (1, C_out)
    out_ref: (bb*N, C_out)  node-major rows -> lane-dense store (lanes = C_out)
    """
    # --- message passing: one MXU call over all bb*C_in rows (bf16 in, f32 acc)
    x = x_ref[...].astype(jnp.bfloat16)
    adj = adj_ref[...].astype(jnp.bfloat16)
    h = jnp.dot(x, adj, preferred_element_type=jnp.float32)       # (bb*C_in, N)
    h = _leaky_relu(h)                                            # f32 VPU

    # --- re-layout to node-major so the 1x1 conv contracts C_in ---------------
    # (bb*C_in, N) -> (bb, C_in, N) -> (bb, N, C_in) -> (bb*N, C_in)
    h = h.reshape(bb, c_in, n_nodes)
    h = jnp.transpose(h, (0, 2, 1)).reshape(bb * n_nodes, c_in)

    # --- pointwise Conv1d: (bb*N, C_in) @ (C_in, C_out) + bias ----------------
    y = jnp.dot(h.astype(jnp.bfloat16), wt_ref[...].astype(jnp.bfloat16),
                preferred_element_type=jnp.float32)               # (bb*N, C_out)
    y = _leaky_relu(y + b_ref[...])                               # lane-broadcast bias
    out_ref[...] = y.astype(out_ref.dtype)


def graph_convolution(adj, nodes, weight, bias, *, batch_block=None):
    """adj (N,N), nodes (B,C_in,N), weight (C_out,C_in), bias (C_out,) -> (B,C_out,N)."""
    B, C_in, N = nodes.shape
    C_out = weight.shape[0]

    if batch_block is None:
        # Largest divisor of B giving <= ~512 rows (bb*C_in) per grid step.
        # At the toy sizes in __main__ this is bb = B -> a single grid step.
        batch_block = 1
        for bb in range(B, 0, -1):
            if B % bb == 0 and bb * C_in <= max(512, C_in):
                batch_block = bb
                break
    num_blocks = B // batch_block
    if num_blocks > 1 and ((batch_block * C_in) % 8 or (batch_block * N) % 8):
        # Keep block sublane dims (8-)aligned; fall back to one full block.
        batch_block, num_blocks = B, 1

    x2d = nodes.reshape(B * C_in, N)       # batch folded into matmul M (free reshape)
    wt = weight.T                          # (C_in, C_out)
    b2d = bias.reshape(1, C_out)

    kernel = functools.partial(_gcn_kernel, bb=batch_block, c_in=C_in, n_nodes=N)

    out2d = pl.pallas_call(
        kernel,
        out_shape=jax.ShapeDtypeStruct((B * N, C_out), nodes.dtype),
        grid_spec=pltpu.PrefetchScalarGridSpec(
            num_scalar_prefetch=0,
            grid=(num_blocks,),
            in_specs=[
                # per-block activations (batch folded into rows)
                pl.BlockSpec((batch_block * C_in, N), lambda i: (i, 0)),
                # grid-invariant operands (constant index_map -> fetched once)
                pl.BlockSpec((N, N), lambda i: (0, 0)),
                pl.BlockSpec((C_in, C_out), lambda i: (0, 0)),
                pl.BlockSpec((1, C_out), lambda i: (0, 0)),
            ],
            out_specs=pl.BlockSpec((batch_block * N, C_out), lambda i: (i, 0)),
        ),
        compiler_params=pltpu.CompilerParams(
            dimension_semantics=("parallel",),
            # Raise the scoped-VMEM default (16 MiB on v5e) so a fully resident
            # adj keeps working at larger N; still below every generation's
            # physical VMEM.
            # TODO(synk): for very large N on v7x (64 MiB VMEM) add a K-tiling
            # ("arbitrary") grid axis over adj instead of relying on residency.
            vmem_limit_bytes=32 * 1024 * 1024,
        ),
    )(x2d, adj, wt, b2d)

    # Back to PyTorch's (B, C_out, N) layout (wrapper-side layout plumbing).
    return out2d.reshape(B, N, C_out).transpose(0, 2, 1)


def _reference(adj, nodes, weight, bias):
    h = _leaky_relu(jnp.einsum("bcn,nm->bcm", nodes, adj))
    y = jnp.einsum("oc,bcn->bon", weight, h) + bias[None, :, None]
    return _leaky_relu(y)


if __name__ == "__main__":
    # Small shapes consistent with the module: batch=2, in_dim=32, out_dim=32, nodes=8
    B, C_in, C_out, N = 2, 32, 32, 8
    key = jax.random.PRNGKey(0)
    k_adj, k_nodes, k_w, k_b = jax.random.split(key, 4)

    adj = jax.random.uniform(k_adj, (N, N), dtype=jnp.float32)
    nodes = jax.random.normal(k_nodes, (B, C_in, N), dtype=jnp.float32)
    # Deterministic Conv1d(in_dim, out_dim, 1) parameters (kernel-size dim squeezed).
    weight = jax.random.normal(k_w, (C_out, C_in), dtype=jnp.float32) * 0.1
    bias = jax.random.normal(k_b, (C_out,), dtype=jnp.float32) * 0.1

    out = jax.block_until_ready(graph_convolution(adj, nodes, weight, bias))
    ref = _reference(adj, nodes, weight, bias)

    assert out.shape == (B, C_out, N)
    # bf16 MXU operands with f32 accumulation -> tolerance loosened vs f32 reference.
    assert jnp.allclose(out, ref, atol=5e-2, rtol=5e-2), float(jnp.max(jnp.abs(out - ref)))
    print("KERNEL_OK")
</pallas_src>

<mosaic_0001>
module attributes {stable_mosaic.version = 11 : i64} {
  func.func @_gcn_kernel(%arg0: i32, %arg1: memref<64x8xf32, #tpu.memory_space<vmem>>, %arg2: memref<8x8xf32, #tpu.memory_space<vmem>>, %arg3: memref<32x32xf32, #tpu.memory_space<vmem>>, %arg4: memref<1x32xf32, #tpu.memory_space<vmem>>, %arg5: memref<16x32xf32, #tpu.memory_space<vmem>>) attributes {dimension_semantics = [#tpu.dimension_semantics<parallel>], iteration_bounds = array<i64: 1>, scalar_prefetch = 0 : i64, scratch_operands = 0 : i64, tpu.core_type = #tpu.core_type<tc>, window_params = [{transform_indices = @transform_0, window_bounds = array<i64: 64, 8>}, {pipeline_mode = #tpu.pipeline_mode<synchronous>, transform_indices = @transform_1, window_bounds = array<i64: 8, 8>}, {pipeline_mode = #tpu.pipeline_mode<synchronous>, transform_indices = @transform_2, window_bounds = array<i64: 32, 32>}, {pipeline_mode = #tpu.pipeline_mode<synchronous>, transform_indices = @transform_3, window_bounds = array<i64: 1, 32>}, {transform_indices = @transform_4, window_bounds = array<i64: 16, 32>}]} {
    %c0 = arith.constant 0 : index
    %c0_0 = arith.constant 0 : index
    %0 = vector.load %arg1[%c0, %c0_0] : memref<64x8xf32, #tpu.memory_space<vmem>>, vector<64x8xf32>
    %1 = arith.truncf %0 : vector<64x8xf32> to vector<64x8xbf16>
    %c0_1 = arith.constant 0 : index
    %c0_2 = arith.constant 0 : index
    %2 = vector.load %arg2[%c0_1, %c0_2] : memref<8x8xf32, #tpu.memory_space<vmem>>, vector<8x8xf32>
    %3 = arith.truncf %2 : vector<8x8xf32> to vector<8x8xbf16>
    %cst = arith.constant dense<0.000000e+00> : vector<64x8xf32>
    %4 = tpu.matmul %1, %3, %cst {dimension_numbers = #tpu.dot_dimension_numbers<[1], [0], [0], [1], [0, 0, 1, 1], [], []>} : vector<64x8xbf16>, vector<8x8xbf16>, vector<64x8xf32> -> vector<64x8xf32>
    %cst_3 = arith.constant 0.000000e+00 : f32
    %5 = vector.broadcast %cst_3 : f32 to vector<64x8xf32>
    %6 = arith.cmpf ogt, %4, %5 : vector<64x8xf32>
    %cst_4 = arith.constant 2.000000e-01 : f32
    %7 = vector.broadcast %cst_4 : f32 to vector<64x8xf32>
    %8 = arith.mulf %7, %4 : vector<64x8xf32>
    %9 = arith.select %6, %4, %8 : vector<64x8xi1>, vector<64x8xf32>
    %10 = vector.shape_cast %9 : vector<64x8xf32> to vector<2x32x8xf32>
    %11 = tpu.transpose %10, [0, 2, 1] : vector<2x32x8xf32> -> vector<2x8x32xf32>
    %12 = vector.shape_cast %11 : vector<2x8x32xf32> to vector<16x32xf32>
    %13 = arith.truncf %12 : vector<16x32xf32> to vector<16x32xbf16>
    %c0_5 = arith.constant 0 : index
    %c0_6 = arith.constant 0 : index
    %14 = vector.load %arg3[%c0_5, %c0_6] : memref<32x32xf32, #tpu.memory_space<vmem>>, vector<32x32xf32>
    %15 = arith.truncf %14 : vector<32x32xf32> to vector<32x32xbf16>
    %cst_7 = arith.constant dense<0.000000e+00> : vector<16x32xf32>
    %16 = tpu.matmul %13, %15, %cst_7 {dimension_numbers = #tpu.dot_dimension_numbers<[1], [0], [0], [1], [0, 0, 1, 1], [], []>} : vector<16x32xbf16>, vector<32x32xbf16>, vector<16x32xf32> -> vector<16x32xf32>
    %c0_8 = arith.constant 0 : index
    %c0_9 = arith.constant 0 : index
    %17 = vector.load %arg4[%c0_8, %c0_9] : memref<1x32xf32, #tpu.memory_space<vmem>>, vector<1x32xf32>
    %18 = vector.broadcast %17 : vector<1x32xf32> to vector<16x32xf32>
    %19 = arith.addf %16, %18 : vector<16x32xf32>
    %cst_10 = arith.constant 0.000000e+00 : f32
    %20 = vector.broadcast %cst_10 : f32 to vector<16x32xf32>
    %21 = arith.cmpf ogt, %19, %20 : vector<16x32xf32>
    %cst_11 = arith.constant 2.000000e-01 : f32
    %22 = vector.broadcast %cst_11 : f32 to vector<16x32xf32>
    %23 = arith.mulf %22, %19 : vector<16x32xf32>
    %24 = arith.select %21, %19, %23 : vector<16x32xi1>, vector<16x32xf32>
    %c0_12 = arith.constant 0 : index
    %c0_13 = arith.constant 0 : index
    %25 = vector.load %arg5[%c0_12, %c0_13] : memref<16x32xf32, #tpu.memory_space<vmem>>, vector<16x32xf32>
    tpu.vector_store %arg5[%c0_12, %c0_13], %24 {strides = array<i32>} : memref<16x32xf32, #tpu.memory_space<vmem>>, vector<16x32xf32>,
    return
  }
  func.func @transform_0(%arg0: i32) -> (i32, i32) {
    %c0_i32 = arith.constant 0 : i32
    %c0_i32_0 = arith.constant 0 : i32
    return %arg0, %c0_i32 : i32, i32
  }
  func.func @transform_1(%arg0: i32) -> (i32, i32) {
    %c0_i32 = arith.constant 0 : i32
    %c0_i32_0 = arith.constant 0 : i32
    %c0_i32_1 = arith.constant 0 : i32
    return %c0_i32, %c0_i32_0 : i32, i32
  }
  func.func @transform_2(%arg0: i32) -> (i32, i32) {
    %c0_i32 = arith.constant 0 : i32
    %c0_i32_0 = arith.constant 0 : i32
    %c0_i32_1 = arith.constant 0 : i32
    return %c0_i32, %c0_i32_0 : i32, i32
  }
  func.func @transform_3(%arg0: i32) -> (i32, i32) {
    %c0_i32 = arith.constant 0 : i32
    %c0_i32_0 = arith.constant 0 : i32
    %c0_i32_1 = arith.constant 0 : i32
    return %c0_i32, %c0_i32_0 : i32, i32
  }
  func.func @transform_4(%arg0: i32) -> (i32, i32) {
    %c0_i32 = arith.constant 0 : i32
    %c0_i32_0 = arith.constant 0 : i32
    return %arg0, %c0_i32 : i32, i32
  }
}

</mosaic_0001>

<bundles_post_ra>
// kernel: tpu_custom_call.1
= control target key start
LH: loop header
LB: loop body
LE: loop exit
PB: predicated region body
PF: predicated region fallthrough
CT: control target
= control target key end

     0   :  { %vm46_vm0 = vcmask 1043456   ;;  %vm33_vm1 = vcmask 64512   ;;  %s454_s0 = inlined_call_operand.vmem [shape: f32[64,8], index: 0, kind: input, shape index: {}]   ;;  %s455_s1 = inlined_call_operand.vmem [shape: f32[8,8], index: 1, kind: input, shape index: {}]   ;;  %s456_s2 = inlined_call_operand.vmem [shape: f32[32,32], index: 2, kind: input, shape index: {}]   ;;  %s457_s3 = inlined_call_operand.vmem [shape: f32[1,32], index: 3, kind: input, shape index: {}]   ;;  %s458_s4 = inlined_call_operand.hbm [shape: f32[16,32], index: 4, kind: output, shape index: {}]  }
   0x1   :  { %v31_v0 = vld [vmem:[%s455_s1] sm:$0xff]  ;;  %v20_v2 = vld [vmem:[%s454_s0 + $0x8] sm:$0xff]  ;;  %v21_v5 = vld [vmem:[%s454_s0 + $0x10] sm:$0xff] }
   0x2   :  { %v19_v1 = vld [vmem:[%s454_s0] sm:$0xff]  ;;  %v32_v3 = vpack.c.bf16 %v31_v0, %v31_v0  ;;  %v22_v6 = vld [vmem:[%s454_s0 + $0x18] sm:$0xff]  ;;  %v24_v8 = vld [vmem:[%s454_s0 + $0x28] sm:$0xff] }
   0x3   :  { %v27_v4 = vpack.c.bf16 %v20_v2, %v19_v1  ;;  %v23_v7 = vld [vmem:[%s454_s0 + $0x20] sm:$0xff]  ;;  %v28_v10 = vpack.c.bf16 %v22_v6, %v21_v5 }
   0x4   :  { %318 = vmatprep.subr.msk.bf16.mxu0 %vm46_vm0, %v32_v3  ;;  %v48_v9 = vsel %vm46_vm0, %v32_v3, 0 }
   0x5   :  { %302 = vmatprep.mubr.msk.bf16.mxu0 %vm33_vm1, %v27_v4 }
   0x6   :  { %9 = vsyncpa [#allocation3], 0  ;;  %301 = vmatpush3.bf16.msra.mxu0 %v48_v9  ;;  %v29_v11 = vpack.c.bf16 %v24_v8, %v23_v7  ;;  %v25_v12 = vld [vmem:[%s454_s0 + $0x30] sm:$0xff]  ;;  %v26_v13 = vld [vmem:[%s454_s0 + $0x38] sm:$0xff]  ;;  %v361_v17 = vmov 0.0   ;;  %vm362_vm10 = vmmov 0  }
   0x7   :  { %v30_v14 = vpack.c.bf16 %v26_v13, %v25_v12  ;;  %v204_v15 = vld [vmem:[%s456_s2] sm:$0xff]  ;;  %v205_v16 = vld [vmem:[%s456_s2 + $0x8] sm:$0xff]  ;;  %310 = vmatprep.subr.bf16.mxu1 %v361_v17  ;;  %v206_v46 = vld [vmem:[%s456_s2 + $0x10] sm:$0xff]  ;;  %314 = vmatprep.mubr.msk.bf16.mxu1 %vm362_vm10, %v361_v17  ;;  %vm217_vm11 = vcmask 261120  }
   0x8   :  { %v208_v18 = vpack.c.bf16 %v205_v16, %v204_v15  ;;  %v207_v47 = vld [vmem:[%s456_s2 + $0x18] sm:$0xff]  ;;  %v290_v54 = vld [vmem:[%s457_s3] ss:$0 sm:$0xff]  ;;  %s363_s2 = smov [#allocation2]  }
   0x9   :  { %303 = vmatmul.mubr.msk.bf16.vlgmr.msra.gmra.mrb[0].mxu0 %vm33_vm1, %v28_v10  ;;  %v209_v49 = vpack.c.bf16 %v207_v47, %v206_v46  ;;  %s275_s15 = sshll.u32 %s363_s2, 4  ;;  %s276_s15 = int_to_ptr.vmem [resolvable:$true] %s275_s15 }
   0xa   :  { %306 = vmatprep.mubr.msk.bf16.mxu0 %vm33_vm1, %v29_v11  ;;  %311 = vmatpush3.bf16.msra.mxu1 %v208_v18  ;;  %s337_s3 = scalar_lea.vmem %s276_s15, 256  ;;  %p342_p1 = scmp.lt.s32.totalorder %s276_s15, %s276_s15 }
   0xb   :  { %312 = vmatprep.subr.bf16.mxu1 %v361_v17  ;;  %p338_p0 = scmp.ne.s32.totalorder %s276_s15, %s337_s3  ;;  %p343_p2 = scmp.lt.s32.totalorder %s337_s3, %s337_s3 }
   0xd   :  { %p344_p3 = por %p343_p2, %p342_p1 }
   0xe   :  { %313 = vmatpush3.bf16.msra.mxu1 %v209_v49 }
   0xf   :  { %p345_p4 = pnand %p344_p3, %p338_p0 }
  0x11   :  { %307 = vmatmul.mubr.msk.bf16.gmra.mrb[4].mxu0 %vm33_vm1, %v30_v14 }
  0xdc   :  { %v304_v19 = vpop.f32.mrb[0].mxu0 }
  0xdd   :  { %v84_v20 = vpop.f32.mrb[1].mxu0  ;;  %v125_v23 = vmul.f32 0.2, %v304_v19  ;;  %vm117_vm2 = vcmp.gt.f32.partialorder %v304_v19, 0.0 }
  0xde   :  { %v305_v21 = vpop.f32.mrb[2].mxu0  ;;  %v123_v24 = vmul.f32 0.2, %v84_v20  ;;  %vm115_vm3 = vcmp.gt.f32.partialorder %v84_v20, 0.0 }
  0xdf   :  { %v87_v22 = vpop.f32.mrb[3].mxu0  ;;  %v126_v25 = vmul.f32 0.2, %v305_v21  ;;  %vm118_vm4 = vcmp.gt.f32.partialorder %v305_v21, 0.0  ;;  %v133_v32 = vsel %vm117_vm2, %v304_v19, %v125_v23 }
  0xe0   :  { %vm116_vm5 = vcmp.gt.f32.partialorder %v87_v22, 0.0  ;;  %v124_v29 = vmul.f32 0.2, %v87_v22  ;;  %v131_v35 = vsel %vm115_vm3, %v84_v20, %v123_v24 }
  0xe1   :  { %v134_v41 = vsel %vm118_vm4, %v305_v21, %v126_v25 }
  0xe2   :  { %v132_v44 = vsel %vm116_vm5, %v87_v22, %v124_v29 }
  0xe4   :  { %v308_v26 = vpop.f32.mrb[4].mxu0 }
  0xe5   :  { %vm121_vm6 = vcmp.gt.f32.partialorder %v308_v26, 0.0  ;;  %v129_v27 = vmul.f32 0.2, %v308_v26  ;;  %v100_v28 = vpop.f32.mrb[5].mxu0 }
  0xe6   :  { %v127_v30 = vmul.f32 0.2, %v100_v28  ;;  %v309_v31 = vpop.f32.mrb[6].mxu0  ;;  %vm119_vm7 = vcmp.gt.f32.partialorder %v100_v28, 0.0 }
  0xe7   :  { %vm122_vm8 = vcmp.gt.f32.partialorder %v309_v31, 0.0  ;;  %v130_v33 = vmul.f32 0.2, %v309_v31  ;;  %v103_v34 = vpop.f32.mrb[7].mxu0  ;;  %v137_v36 = vsel %vm121_vm6, %v308_v26, %v129_v27 }
  0xe8   :  { %vm120_vm9 = vcmp.gt.f32.partialorder %v103_v34, 0.0  ;;  %v128_v37 = vmul.f32 0.2, %v103_v34  ;;  %v135_v38 = vsel %vm119_vm7, %v100_v28, %v127_v30  ;;  %v328_v39 = vpack.i.bf16 %v137_v36, %v133_v32 }
  0xe9   :  { %v324_v40 = vpack.i.bf16 %v135_v38, %v131_v35  ;;  %v138_v42 = vsel %vm122_vm8, %v309_v31, %v130_v33 }
  0xea   :  { %v136_v43 = vsel %vm120_vm9, %v103_v34, %v128_v37  ;;  %v330_v45 = vpack.i.bf16 %v138_v42, %v134_v41 }
  0xeb   :  { %325 = vxpose.xlu0.b32.start [1/4] (short) (narrow) %v324_v40, 8  ;;  %v326_v48 = vpack.i.bf16 %v136_v43, %v132_v44 }
  0xef   :  { %327 = vxpose.xlu0.b32.cont [2/4] (short) (narrow) %v326_v48, 8 }
  0xf3   :  { %329 = vxpose.xlu0.b32.cont [3/4] (short) (narrow) %v328_v39, 8 }
  0xf7   :  { %331 = vxpose.xlu0.b32.end [4/4] (short) (narrow) %v330_v45, 8 }
 0x16b   :  { %v332_v50 = vpop.trf.xlu0 }
 0x16c   :  { %v336_v51 = vunpack.i.h.bf16 %v332_v50  ;;  %v333_v52 = vunpack.i.l.bf16 %v332_v50 }
 0x16e   :  { %v203_v53 = vpack.c.bf16 %v336_v51, %v333_v52 }
 0x170   :  { %315 = vmatmul.mubr.msk.bf16.vlgmr.msra.gmra.mrb[0].mxu1 %vm217_vm11, %v203_v53 }
 0x243   :  { %v255_v55 = vpop.f32.mrb[0].mxu1 }
 0x244   :  { %v256_v56 = vadd.f32 %v290_v54, %v255_v55  ;;  %v316_v57 = vpop.f32.mrb[1].mxu1 }
 0x245   :  { %v258_v58 = vpop.f32.mrb[2].mxu1 }
 0x246   :  { %vm262_vm12 = vcmp.gt.f32.partialorder %v256_v56, 0.0  ;;  %v264_v59 = vmul.f32 0.2, %v256_v56  ;;  %v259_v60 = vadd.f32 %v290_v54, %v258_v58  ;;  %v317_v61 = vpop.f32.mrb[3].mxu1 }
 0x248   :  { %v266_v62 = vsel %vm262_vm12, %v256_v56, %v264_v59  ;;  %vm263_vm13 = vcmp.gt.f32.partialorder %v259_v60, 0.0  ;;  %v265_v63 = vmul.f32 0.2, %v259_v60 }
 0x249   :  { %268 = vst.msk [vmem:[#allocation2] sm:$0xff] %vm217_vm11, %v266_v62 }
 0x24a   :  { %v267_v0 = vsel %vm263_vm13, %v259_v60, %v265_v63 }
 0x24b   :  { %269 = vst.msk [vmem:[#allocation2 + $0x8] sm:$0xff] %vm217_vm11, %v267_v0 }
 0x24c   :  { %348 = shalt.err (!%p345_p4)
}
 0x24d   :  { %s349_s18 = scalar_lea.hbm %s458_s4, 256 }
 0x24e   :  { %p350_p5 = scmp.ne.s32.totalorder %s458_s4, %s349_s18  ;;  %p353_p6 = scmp.lt.u32.totalorder %s349_s18, %s458_s4 }
 0x250   :  { %p355_p7 = pnand %p353_p6, %p350_p5 }
 0x252   :  { %358 = shalt.err (!%p355_p7)
}
 0x253   :  { %s364_s23 = smov 128   ;;  %s365_s24 = smov 8  }
 0x254   :  { %281 = dma.vmem_to_hbm [thread:$0]  %s276_s15, 256, %s458_s4, [#allocation3], %s364_s23, %s364_s23, %s365_s24  }
 0x255   :  { %359 = dma.done.wait [#allocation3], 256  }
 0x256   :  { %360 = vsyncadd [#allocation3], 4294967040 }
 0x257   :  { %285 = vsyncpa [#allocation3], 1 }

</bundles_post_ra>
